<compile_context>
chip_gen: v7x
topology: tpu7x:2x2x1
jax: 0.10.0
libtpu: 0.0.40
codegen_flags: <defaults>
</compile_context>

<pallas_src>
import jax
import jax.numpy as jnp
from jax.experimental import pallas as pl
from jax.experimental.pallas import tpu as pltpu

EPS = 1e-9

# Per-(half, TC) f32 working-block budget.  Keeps total VMEM use (double-
# buffered in/out blocks + f32 temporaries) comfortably inside the scoped
# limit on every chip (v5e/v6e: 128 MiB physical, v7x: 64 MiB physical).
_BLOCK_BUDGET_BYTES = 4 * 1024 * 1024


def _dsbn_kernel(x_ref, g_ref, b_ref, o_ref):
    # x_ref: (half, TC) -- one domain-half x one channel tile
    # g_ref, b_ref: (1, 1, TC) -- gamma / beta for this domain & channel tile
    x = x_ref[...].astype(jnp.float32)                    # (H, TC)

    mean = jnp.mean(x, axis=0, keepdims=True)             # (1, TC) XLU reduce
    xc = x - mean
    var = jnp.mean(xc * xc, axis=0, keepdims=True)        # biased variance
    inv_std = jax.lax.rsqrt(var + EPS)                    # EUP slot

    gamma = g_ref[0]                                      # (1, TC) hoisted once
    beta = b_ref[0]                                       # (1, TC)
    scale = inv_std * gamma                               # (1, TC)
    shift = beta - mean * scale                           # (1, TC)

    # 2 VALU ops per element; output tile is lane-dense (TC multiple of 128).
    o_ref[...] = (x * scale + shift).astype(o_ref.dtype)


def _jax_fallback(x, gamma, beta):
    """Pure-JAX path for degenerate shapes (identical semantics)."""
    B, _ = x.shape
    half = B // 2

    def bn(xh, g, b):
        xh = xh.astype(jnp.float32)
        m = xh.mean(axis=0, keepdims=True)
        v = ((xh - m) ** 2).mean(axis=0, keepdims=True)
        return ((xh - m) * jax.lax.rsqrt(v + EPS)) * g + b

    y1 = bn(x[:half], gamma[0, 0], beta[0, 0])
    y2 = bn(x[half:], gamma[1, 0], beta[1, 0])
    return jnp.concatenate([y1, y2], axis=0).astype(x.dtype)


def _pick_channel_tile(half, C):
    """Largest lane-dense (multiple of 128) channel tile dividing C whose
    (half, TC) f32 block fits the VMEM budget. Returns None if nothing fits."""
    if C % 128 != 0:
        # Full-channel block (block dim == full array dim is always allowed).
        if half * C * 4 <= _BLOCK_BUDGET_BYTES:
            return C
        return None
    for tc in (2048, 1024, 512, 256, 128):
        if C % tc == 0 and half * tc * 4 <= _BLOCK_BUDGET_BYTES:
            return tc
    return None


def dsbn1d_forward(x, gamma1, beta1, gamma2, beta2, step=0):
    """Pallas implementation of DomainModalSpecificBatchNorm1d.forward.

    x: (B, C) float array. Returns (normalized x, step).
    """
    assert x.ndim == 2, "expected 2D input"
    B, C = x.shape
    half = B // 2
    assert half * 2 == B, "batch must be even for the half/half split"

    # Stack per-domain affine params: (2, 1, C)
    gamma = jnp.stack([gamma1, gamma2], axis=0).reshape(2, 1, C).astype(jnp.float32)
    beta = jnp.stack([beta1, beta2], axis=0).reshape(2, 1, C).astype(jnp.float32)

    itemsize = jnp.dtype(x.dtype).itemsize
    sublane = {4: 8, 2: 16, 1: 32}.get(itemsize, 8)
    tc = _pick_channel_tile(half, C)
    if (half % sublane != 0) or (tc is None):
        # Rows not sublane-aligned (BlockSpec would need masked stats) or one
        # channel tile of the half doesn't fit VMEM: use the plain-JAX path.
        return _jax_fallback(x, gamma, beta), step

    num_c_tiles = C // tc

    # VMEM estimate: double-buffered in + out blocks plus f32 temporaries.
    block_bytes = half * tc * itemsize
    f32_block_bytes = half * tc * 4
    work_bytes = 2 * block_bytes * 2 + 3 * f32_block_bytes
    vmem_limit = int(min(32 * 1024 * 1024, max(16 * 1024 * 1024, 2 * work_bytes)))

    out = pl.pallas_call(
        _dsbn_kernel,
        out_shape=jax.ShapeDtypeStruct((B, C), x.dtype),
        grid_spec=pltpu.PrefetchScalarGridSpec(
            num_scalar_prefetch=0,
            grid=(2, num_c_tiles),  # (domain, channel tile) -- fully independent
            in_specs=[
                pl.BlockSpec((half, tc), lambda d, j: (d, j)),
                pl.BlockSpec((1, 1, tc), lambda d, j: (d, 0, j)),
                pl.BlockSpec((1, 1, tc), lambda d, j: (d, 0, j)),
            ],
            out_specs=pl.BlockSpec((half, tc), lambda d, j: (d, j)),
        ),
        compiler_params=pltpu.CompilerParams(
            dimension_semantics=("parallel", "parallel"),
            vmem_limit_bytes=vmem_limit,
        ),
    )(x, gamma, beta)
    return out, step


def _reference(x, gamma1, beta1, gamma2, beta2):
    B, _ = x.shape
    half = B // 2

    def bn(xh, g, b):
        xh = xh.astype(jnp.float32)
        m = xh.mean(axis=0, keepdims=True)
        v = ((xh - m) ** 2).mean(axis=0, keepdims=True)
        return ((xh - m) / jnp.sqrt(v + EPS)) * g + b

    y1 = bn(x[:half], gamma1, beta1)
    y2 = bn(x[half:], gamma2, beta2)
    return jnp.concatenate([y1, y2], axis=0).astype(x.dtype)


if __name__ == "__main__":
    key = jax.random.PRNGKey(0)
    k_x, k_g1, k_g2 = jax.random.split(key, 3)

    # Small shapes that still exercise the tiled path: each domain half has
    # 8 rows (sublane-aligned for f32) and C=256 -> two 128-wide channel tiles.
    B, C = 16, 256
    x = jax.random.normal(k_x, (B, C), dtype=jnp.float32)

    # Deterministic param init mimicking weights_init_kaiming for BatchNorm1d:
    #   weight ~ Normal(1.0, 0.01), bias = 0
    gamma1 = 1.0 + 0.01 * jax.random.normal(k_g1, (C,), dtype=jnp.float32)
    gamma2 = 1.0 + 0.01 * jax.random.normal(k_g2, (C,), dtype=jnp.float32)
    beta1 = jnp.zeros((C,), dtype=jnp.float32)
    beta2 = jnp.zeros((C,), dtype=jnp.float32)

    out, step = dsbn1d_forward(x, gamma1, beta1, gamma2, beta2, step=0)
    out = jax.block_until_ready(out)

    ref = _reference(x, gamma1, beta1, gamma2, beta2)
    assert jnp.allclose(out, ref, atol=1e-5, rtol=1e-5), "mismatch vs reference"
    assert step == 0

    print("KERNEL_OK")
</pallas_src>

<mosaic_0001>
module attributes {stable_mosaic.version = 11 : i64} {
  func.func @_dsbn_kernel(%arg0: i32, %arg1: i32, %arg2: memref<8x256xf32, #tpu.memory_space<vmem>>, %arg3: memref<1x1x256xf32, #tpu.memory_space<vmem>>, %arg4: memref<1x1x256xf32, #tpu.memory_space<vmem>>, %arg5: memref<8x256xf32, #tpu.memory_space<vmem>>) attributes {dimension_semantics = [#tpu.dimension_semantics<parallel>, #tpu.dimension_semantics<parallel>], iteration_bounds = array<i64: 2, 1>, scalar_prefetch = 0 : i64, scratch_operands = 0 : i64, tpu.core_type = #tpu.core_type<tc>, window_params = [{transform_indices = @transform_0, window_bounds = array<i64: 8, 256>}, {transform_indices = @transform_1, window_bounds = array<i64: 1, 1, 256>}, {transform_indices = @transform_2, window_bounds = array<i64: 1, 1, 256>}, {transform_indices = @transform_3, window_bounds = array<i64: 8, 256>}]} {
    %c0 = arith.constant 0 : index
    %c0_0 = arith.constant 0 : index
    %0 = vector.load %arg2[%c0, %c0_0] : memref<8x256xf32, #tpu.memory_space<vmem>>, vector<8x256xf32>
    %cst = arith.constant dense<0.000000e+00> : vector<256xf32>
    %1 = vector.multi_reduction <add>, %0, %cst [0] : vector<8x256xf32> to vector<256xf32>
    %2 = vector.shape_cast %1 : vector<256xf32> to vector<1x256xf32>
    %cst_1 = arith.constant 8.000000e+00 : f32
    %3 = vector.broadcast %cst_1 : f32 to vector<1x256xf32>
    %4 = arith.divf %2, %3 : vector<1x256xf32>
    %5 = vector.broadcast %4 : vector<1x256xf32> to vector<8x256xf32>
    %6 = arith.subf %0, %5 : vector<8x256xf32>
    %7 = arith.mulf %6, %6 : vector<8x256xf32>
    %cst_2 = arith.constant dense<0.000000e+00> : vector<256xf32>
    %8 = vector.multi_reduction <add>, %7, %cst_2 [0] : vector<8x256xf32> to vector<256xf32>
    %9 = vector.shape_cast %8 : vector<256xf32> to vector<1x256xf32>
    %cst_3 = arith.constant 8.000000e+00 : f32
    %10 = vector.broadcast %cst_3 : f32 to vector<1x256xf32>
    %11 = arith.divf %9, %10 : vector<1x256xf32>
    %cst_4 = arith.constant 9.99999971E-10 : f32
    %12 = vector.broadcast %cst_4 : f32 to vector<1x256xf32>
    %13 = arith.addf %11, %12 : vector<1x256xf32>
    %14 = math.rsqrt %13 : vector<1x256xf32>
    %c0_5 = arith.constant 0 : index
    %c0_6 = arith.constant 0 : index
    %c0_7 = arith.constant 0 : index
    %15 = vector.load %arg3[%c0_5, %c0_6, %c0_7] : memref<1x1x256xf32, #tpu.memory_space<vmem>>, vector<1x1x256xf32>
    %16 = vector.shape_cast %15 : vector<1x1x256xf32> to vector<1x256xf32>
    %c0_8 = arith.constant 0 : index
    %c0_9 = arith.constant 0 : index
    %c0_10 = arith.constant 0 : index
    %17 = vector.load %arg4[%c0_8, %c0_9, %c0_10] : memref<1x1x256xf32, #tpu.memory_space<vmem>>, vector<1x1x256xf32>
    %18 = vector.shape_cast %17 : vector<1x1x256xf32> to vector<1x256xf32>
    %19 = arith.mulf %14, %16 : vector<1x256xf32>
    %20 = arith.mulf %4, %19 : vector<1x256xf32>
    %21 = arith.subf %18, %20 : vector<1x256xf32>
    %22 = vector.broadcast %19 : vector<1x256xf32> to vector<8x256xf32>
    %23 = arith.mulf %0, %22 : vector<8x256xf32>
    %24 = vector.broadcast %21 : vector<1x256xf32> to vector<8x256xf32>
    %25 = arith.addf %23, %24 : vector<8x256xf32>
    %c0_11 = arith.constant 0 : index
    %c0_12 = arith.constant 0 : index
    %26 = vector.load %arg5[%c0_11, %c0_12] : memref<8x256xf32, #tpu.memory_space<vmem>>, vector<8x256xf32>
    tpu.vector_store %arg5[%c0_11, %c0_12], %25 {strides = array<i32>} : memref<8x256xf32, #tpu.memory_space<vmem>>, vector<8x256xf32>,
    return
  }
  func.func @transform_0(%arg0: i32, %arg1: i32) -> (i32, i32) {
    %c0_i32 = arith.constant 0 : i32
    return %arg0, %arg1 : i32, i32
  }
  func.func @transform_1(%arg0: i32, %arg1: i32) -> (i32, i32, i32) {
    %c0_i32 = arith.constant 0 : i32
    %c0_i32_0 = arith.constant 0 : i32
    return %arg0, %c0_i32, %arg1 : i32, i32, i32
  }
  func.func @transform_2(%arg0: i32, %arg1: i32) -> (i32, i32, i32) {
    %c0_i32 = arith.constant 0 : i32
    %c0_i32_0 = arith.constant 0 : i32
    return %arg0, %c0_i32, %arg1 : i32, i32, i32
  }
  func.func @transform_3(%arg0: i32, %arg1: i32) -> (i32, i32) {
    %c0_i32 = arith.constant 0 : i32
    return %arg0, %arg1 : i32, i32
  }
}

</mosaic_0001>

<bundles_post_ra>
// kernel: tpu_custom_call.1
= control target key start
LH: loop header
LB: loop body
LE: loop exit
PB: predicated region body
PF: predicated region fallthrough
CT: control target
= control target key end

     0   :  { %8 = vsyncpa [#allocation3], 0  ;;  %s1031_s0 = inlined_call_operand.hbm [shape: f32[16,256], index: 0, kind: input, shape index: {}]   ;;  %s1032_s1 = inlined_call_operand.hbm [shape: f32[2,1,256], index: 1, kind: input, shape index: {}]   ;;  %s1033_s2 = inlined_call_operand.vmem [shape: f32[2,1,256], index: 2, kind: input, shape index: {}]   ;;  %s1034_s3 = inlined_call_operand.hbm [shape: f32[16,256], index: 3, kind: output, shape index: {}]  }
   0x1   :  { %10 = vsyncpa [#allocation3 + $0x1], 0 }
   0x2   :  { %11 = vsyncpa [#allocation6], 0 }
   0x3   :  { %13 = vsyncpa [#allocation6 + $0x1], 0 }
   0x4   :  { %14 = vsyncpa [#allocation4], 0 }
   0x5   :  { %16 = vsyncpa [#allocation4 + $0x1], 0  ;;  %s792_s12 = smov 0   ;;  %s794_s13 = smov 0  }
   0x6   :  { %s796_s14 = smov 0   ;;  %s798_s15 = smov 0  }
   0x7   :  { %s800_s16 = smov 0   ;;  %s802_s17 = smov 0  }
   0x8 LB: > { %s525_s18 = sadd.s32 4294967295, %s766_s17   ;;  %s526_s19 = sadd.s32 4294967294, %s766_s17   ;;  %s766_s17 = sphi %s802_s17, %s22_s17   ;;  %s762_s16 = sphi %s800_s16, %s1054_s16   ;;  %s758_s15 = sphi %s798_s15, %s1053_s15   ;;  %s754_s14 = sphi %s796_s14, %s1052_s14   ;;  %s750_s13 = sphi %s794_s13, %s1051_s13   ;;  %s746_s12 = sphi %s792_s12, %s1050_s12  }
   0x9   : > { %s34_s20 = sadd.s32 1, %s762_s16  ;;  %s43_s21 = sadd.s32 1, %s754_s14 }
   0xa   : > { %p36_p0 = scmp.ge.s32.totalorder %s34_s20, 2  ;;  %p50_p1 = scmp.ne.s32.totalorder %s754_s14, %s750_s13 }
   0xb   : > { %p51_p2 = scmp.eq.s32.totalorder %s766_s17, 0  ;;  %p56_p3 = scmp.ne.s32.totalorder %s750_s13, %s746_s12 }
   0xc   : > { %s1056_s20 = smov (%p36_p0, %s34_s20), 0  ;;  %p57_p5 = scmp.eq.s32.totalorder %s525_s18, 0 }
   0xd   : > { %p833_p4 = por %p51_p2, %p50_p1  ;;  %s38_s23 = ssub.s32 %s762_s16, %s1056_s20 }
   0xe   : > { %p138_p6 = scmp.eq.s32.totalorder %s525_s18, 1  ;;  %p41_p7 = scmp.eq.s32.totalorder %s38_s23, 0 }
   0xf   : > { %p839_p8 = por %p57_p5, %p56_p3  ;;  %p144_p10 = scmp.eq.s32.totalorder %s526_s19, 1 }
  0x10   : > { %p843_p9 = por %p138_p6, %p50_p1  ;;  %p565_p13 = scmp.lt.s32.totalorder %s766_s17, 2 }
  0x11   : > { %s1038_s24 = scalar_select %p839_p8, 1, 0 }
  0x12   : > { %s1039_s25 = scalar_select %p843_p9, 1, 0 }
  0x13   : > { %s848_s26 = scalar_select %p41_p7, %s754_s14, %s43_s21  }
  0x14   : > { %p850_p11 = por %p144_p10, %p56_p3  ;;  %s857_s28 = sand.u32 1, %s754_s14  }
  0x15   : > { %s529_s29 = sshll.u32 %s857_s28, 4  ;;  %s545_s30 = sshll.u32 %s762_s16, 8 }
  0x16   : > { %s1040_s27 = scalar_select %p850_p11, 1, 0 }
  0x17   : > { %s864_s6 = scalar_lea.hbm %s1031_s0, %s545_s30  ;;  %s168_s7 = scalar_lea.vmem [#allocation2], %s529_s29 }
  0x18   : > { %s178_s8 = sshll.u32 %s168_s7, 4  ;;  %p870_p0 = pnand %p565_p13, %p833_p4  ;;  %s866_s8 = int_to_ptr.vmem [resolvable:$true] %s178_s8 }
  0x19   : > { %s165_s10 = scalar_lea.sflag [#allocation3], %s857_s28  ;;  %s620_s11 = scalar_lea.hbm %s864_s6, 256 }
  0x1a   : > { %p621_p3 = scmp.ne.s32.totalorder %s864_s6, %s620_s11  ;;  %p622_p5 = pneg %p870_p0 }
  0x1b   : > { %s625_s21 = scalar_lea.hbm %s1031_s0, 512  ;;  %p626_p4 = scmp.lt.u32.totalorder %s864_s6, %s1031_s0 }
  0x1c   : > { %p623_p6 = pnand %p622_p5, %p621_p3  ;;  %p627_p10 = scmp.lt.u32.totalorder %s625_s21, %s620_s11 }
  0x1d   : > { %p629_p12 = scmp.lt.u32.totalorder %s620_s11, %s864_s6 }
  0x1e   : > { %p624_p7 = pneg %p623_p6  ;;  %p628_p13 = por %p627_p10, %p626_p4 }
  0x20   : > { %p630_p1 = por %p629_p12, %p628_p13 }
  0x22   : > { %p631_p2 = pnand %p630_p1, %p624_p7 }
  0x24   : > { %634 = shalt.err (!%p631_p2)
}
  0x25   : > { %s635_s29 = scalar_lea.vmem %s866_s8, 256  ;;  %s768_s30 = smov [#allocation2]  }
  0x26   : > { %p636_p3 = scmp.ne.s32.totalorder %s866_s8, %s635_s29  ;;  %s640_s4 = sshll.u32 %s768_s30, 4  ;;  %s641_s4 = int_to_ptr.vmem [resolvable:$false] %s640_s4 }
  0x27   : > { %s642_s5 = scalar_lea.vmem %s641_s4, 512  ;;  %p643_p9 = scmp.lt.s32.totalorder %s866_s8, %s641_s4 }
  0x28   : > { %p638_p6 = pnand %p636_p3, %p622_p5  ;;  %p644_p4 = scmp.lt.s32.totalorder %s642_s5, %s635_s29 }
  0x2a   : > { %p639_p11 = pneg %p638_p6  ;;  %p645_p10 = por %p644_p4, %p643_p9 }
  0x2c   : > { %p646_p12 = pnand %p645_p10, %p639_p11 }
  0x2e   : > { %649 = shalt.err (!%p646_p12)
}
  0x2f   : > { %557 = dma.hbm_to_vmem [thread:$0]  (!%p870_p0), %s864_s6, 256, %s866_s8, %s165_s10  }
  0x30   : > { %p1042_p1 = scmp.lt.s32.totalorder %s766_s17, 3  ;;  %p1043_p2 = scmp.ge.s32.totalorder %s766_s17, 1 }
  0x31   : > { %s532_s11 = sshll.u32 %s857_s28, 1  ;;  %s546_s18 = sshll.u32 %s762_s16, 5 }
  0x32   : > { %p906_p7 = pnand %p1043_p2, %p1042_p1  ;;  %s915_s22 = scalar_lea.hbm %s1032_s1, %s546_s18 }
  0x33   : > { %s189_s23 = scalar_lea.vmem [#allocation5], %s532_s11  ;;  %s186_s6 = scalar_lea.sflag [#allocation6], %s857_s28 }
  0x34   : > { %s1044_s7 = scalar_select %p906_p7, 1, 0 }
  0x35   : > { %s199_s29 = sshll.u32 %s189_s23, 4  ;;  %s650_s8 = scalar_lea.hbm %s915_s22, 32  ;;  %s200_s29 = int_to_ptr.vmem [resolvable:$true] %s199_s29 }
  0x36   : > { %p651_p9 = scmp.ne.s32.totalorder %s915_s22, %s650_s8  ;;  %s655_s4 = scalar_lea.hbm %s1032_s1, 64 }
  0x37   : > { %p656_p3 = scmp.lt.u32.totalorder %s915_s22, %s1032_s1  ;;  %p657_p6 = scmp.lt.u32.totalorder %s655_s4, %s650_s8 }
  0x38   : > { %p653_p11 = pnand %p651_p9, %p622_p5  ;;  %p659_p10 = scmp.lt.u32.totalorder %s650_s8, %s915_s22 }
  0x39   : > { %p658_p4 = por %p657_p6, %p656_p3 }
  0x3a   : > { %p654_p13 = pneg %p653_p11 }
  0x3b   : > { %p660_p12 = por %p659_p10, %p658_p4 }
  0x3d   : > { %p661_p1 = pnand %p660_p12, %p654_p13 }
  0x3f   : > { %664 = shalt.err (!%p661_p1)
}
  0x40   : > { %s665_s28 = scalar_lea.vmem %s200_s29, 32  ;;  %s769_s11 = smov [#allocation5]  }
  0x41   : > { %p666_p2 = scmp.ne.s32.totalorder %s200_s29, %s665_s28  ;;  %s670_s19 = sshll.u32 %s769_s11, 4  ;;  %s671_s19 = int_to_ptr.vmem [resolvable:$false] %s670_s19 }
  0x42   : > { %s672_s21 = scalar_lea.vmem %s671_s19, 64  ;;  %p673_p8 = scmp.lt.s32.totalorder %s200_s29, %s671_s19 }
  0x43   : > { %p668_p9 = pnand %p666_p2, %p622_p5  ;;  %p674_p7 = scmp.lt.s32.totalorder %s672_s21, %s665_s28 }
  0x45   : > { %p669_p11 = pneg %p668_p9  ;;  %p675_p3 = por %p674_p7, %p673_p8 }
  0x47   : > { %p676_p6 = pnand %p675_p3, %p669_p11 }
  0x49   : > { %679 = shalt.err (!%p676_p6)
}
  0x4a   : > { %560 = dma.hbm_to_vmem [thread:$0]  (!%p870_p0), %s915_s22, 32, %s200_s29, %s186_s6  }
  0x4b   : > { %p1045_p13 = scmp.ne.s32.totalorder %s1044_s7, 0 }
  0x4c   : > { %s940_s23 = sand.u32 (!%p1045_p13), 1, %s750_s13   ;;  %p1046_p8 = scmp.ne.s32.totalorder (!%p1045_p13), %s1038_s24, 0 }
  0x4d   : > { %220 = sbr.rel (%p1045_p13) target bundleno = 165 (0xa5), region = 32  ;;  %s536_s8 = sshll.u32 (!%p1045_p13), %s940_s23, 4 }
  0x4e   : > { %s223_s10 = scalar_lea.sflag (!%p1045_p13), [#allocation3], %s940_s23  ;;  %s226_s30 = scalar_lea.vmem (!%p1045_p13), [#allocation2], %s536_s8 }
  0x54   : > { %733 = dma.done.wait (%p1046_p8), %s223_s10, 256  }
  0x55   : > { %735 = vsyncadd (%p1046_p8), %s223_s10, 4294967040  ;;  %s537_s9 = sshll.u32 %s940_s23, 1  ;;  %s232_s7 = scalar_lea.sflag [#allocation6], %s940_s23 }
  0x56   : > { %s952_s22 = scalar_lea.vmem [#allocation5], %s537_s9 }
  0x57   : > { %737 = dma.done.wait (%p1046_p8), %s232_s7, 32  }
  0x58   : > { %739 = vsyncadd (%p1046_p8), %s232_s7, 4294967264  ;;  %v958_v0 = vld [vmem:[%s226_s30] sm:$0xff]  ;;  %v960_v1 = vld [vmem:[%s226_s30 + $0x8] sm:$0xff]  ;;  %v325_v32 = vlaneseq  ;;  %p274_p0 = scmp.lt.s32.totalorder %s758_s15, 1  ;;  %v770_v41 = vmov 1966171168  }
  0x59   : > { %v285_v2 = vrot.slane %v958_v0, 4  ;;  %v291_v3 = vrot.slane %v960_v1, 4  ;;  %v322_v39 = vld [vmem:[%s952_s22] sm:$0x3]  ;;  %v343_v42 = vunpack.c.l.s4 %v770_v41  ;;  %s270_s18 = scalar_lea.vmem [#allocation7], %s536_s8  ;;  %s547_s11 = sshll.u32 %s758_s15, 8 }
  0x5a   : > { %v326_v37 = vshrl.u32 %v325_v32, 7  ;;  %s275_s24 = scalar_select %p274_p0, %s758_s15, 1 }
  0x5b   : > { %v286_v4 = vadd.f32 %v285_v2, %v958_v0  ;;  %v292_v5 = vadd.f32 %v291_v3, %v960_v1  ;;  %v344_v46 = vunpack.c.0.s8 %v343_v42  ;;  %s400_s28 = sshll.u32 %s270_s18, 4  ;;  %s984_s10 = scalar_lea.hbm %s1034_s3, %s547_s11  ;;  %s979_s28 = int_to_ptr.vmem [resolvable:$true] %s400_s28 }
  0x5c   : > { %v327_v38 = vsub.s32 0, %v326_v37  ;;  %v331_v40 = vsub.s32 1, %v326_v37  ;;  %s539_s29 = sshll.u32 %s275_s24, 1  ;;  %s384_s30 = scalar_lea.sflag [#allocation4], %s940_s23 }
  0x5d   : > { %v287_v6 = vrot.slane %v286_v4, 2  ;;  %v293_v7 = vrot.slane %v292_v5, 2  ;;  %v347_v52 = vsub.s32 %v344_v46, %v326_v37  ;;  %s280_s5 = scalar_lea.vmem %s1033_s2, %s539_s29  ;;  %s680_s8 = scalar_lea.vmem %s979_s28, 256 }
  0x5e   : > { %v328_v43 = vrot.slane %v322_v39, %v327_v38  ;;  %v332_v44 = vrot.slane %v322_v39, %v331_v40  ;;  %v323_v57 = vld [vmem:[%s280_s5] sm:$0x3]  ;;  %p681_p5 = scmp.ne.s32.totalorder %s979_s28, %s680_s8  ;;  %p1047_p7 = scmp.ne.s32.totalorder %s1039_s25, 0 }
  0x5f   : > { %v288_v8 = vadd.f32 %v287_v6, %v286_v4  ;;  %v294_v9 = vadd.f32 %v293_v7, %v292_v5  ;;  %s771_s15 = smov [#allocation7]  }
  0x60   : > { %p682_p4 = pnand %p681_p5, %p1047_p7  ;;  %s684_s9 = sshll.u32 %s771_s15, 4  ;;  %s685_s9 = int_to_ptr.vmem [resolvable:$false] %s684_s9 }
  0x61   : > { %v289_v10 = vrot.slane %v288_v8, 1  ;;  %v295_v11 = vrot.slane %v294_v9, 1  ;;  %s686_s7 = scalar_lea.vmem %s685_s9, 512  ;;  %p687_p12 = scmp.lt.s32.totalorder %s979_s28, %s685_s9 }
  0x62   : > { %p683_p10 = pneg %p682_p4  ;;  %p688_p1 = scmp.lt.s32.totalorder %s686_s7, %s680_s8 }
  0x63   : > { %v290_v12 = vadd.f32 %v289_v10, %v288_v8  ;;  %v296_v13 = vadd.f32 %v295_v11, %v294_v9 }
  0x64   : > { %p689_p2 = por %p688_p1, %p687_p12 }
  0x65   : > { %v298_v14 = vmul.f32 0.125, %v290_v12  ;;  %v299_v15 = vmul.f32 0.125, %v296_v13 }
  0x66   : > { %p690_p9 = pnand %p689_p2, %p683_p10 }
  0x67   : > { %v300_v16 = vsub.f32 %v958_v0, %v298_v14  ;;  %v301_v17 = vsub.f32 %v960_v1, %v299_v15 }
  0x69   : > { %v302_v18 = vmul.f32 %v300_v16, %v300_v16  ;;  %v303_v19 = vmul.f32 %v301_v17, %v301_v17 }
  0x6b   : > { %v304_v20 = vrot.slane %v302_v18, 4  ;;  %v310_v21 = vrot.slane %v303_v19, 4 }
  0x6d   : > { %v305_v22 = vadd.f32 %v304_v20, %v302_v18  ;;  %v311_v23 = vadd.f32 %v310_v21, %v303_v19 }
  0x6f   : > { %v306_v24 = vrot.slane %v305_v22, 2  ;;  %v312_v25 = vrot.slane %v311_v23, 2 }
  0x71   : > { %v307_v26 = vadd.f32 %v306_v24, %v305_v22  ;;  %v313_v27 = vadd.f32 %v312_v25, %v311_v23 }
  0x73   : > { %v308_v28 = vrot.slane %v307_v26, 1  ;;  %v314_v29 = vrot.slane %v313_v27, 1 }
  0x75   : > { %v309_v30 = vadd.f32 %v308_v28, %v307_v26  ;;  %v315_v31 = vadd.f32 %v314_v29, %v313_v27 }
  0x77   : > { %v316_v33 = vmul.f32 0.125, %v309_v30  ;;  %v317_v34 = vmul.f32 0.125, %v315_v31 }
  0x79   : > { %v318_v35 = vadd.f32 1e-09, %v316_v33  ;;  %v319_v36 = vadd.f32 1e-09, %v317_v34 }
  0x7b   : > { %616 = vrsqrt.f32 %v318_v35 }
  0x7c   : > { %618 = vrsqrt.f32 %v319_v36 }
  0x85   : > { %v617_v45 = vpop.eup %616 }
  0x86   : > { %v619_v47 = vpop.eup %618  ;;  %v335_v48 = vmul.f32 %v617_v45, %v328_v43 }
  0x87   : > { %v336_v49 = vmul.f32 %v619_v47, %v332_v44 }
  0x88   : > { %v337_v50 = vmul.f32 %v335_v48, %v298_v14  ;;  %v361_v55 = vrot.slane %v335_v48, %v327_v38 }
  0x89   : > { %v338_v51 = vmul.f32 %v336_v49, %v299_v15  ;;  %v365_v56 = vrot.slane %v336_v49, %v327_v38 }
  0x8a   : > { %v366_v60 = vmul.f32 %v361_v55, %v958_v0 }
  0x8b   : > { %v341_v53 = vcombine.low %v337_v50, %v338_v51  ;;  %v367_v61 = vmul.f32 %v365_v56, %v960_v1 }
  0x8d   : > { %v348_v54 = vrot.slane %v341_v53, %v347_v52 }
  0x8f   : > { %v355_v58 = vrot.slane %v348_v54, %v347_v52 }
  0x91   : > { %v357_v59 = vsub.f32 %v323_v57, %v355_v58 }
  0x93   : > { %v372_v62 = vrot.slane %v357_v59, %v327_v38  ;;  %v376_v63 = vrot.slane %v357_v59, %v331_v40 }
  0x95   : > { %v379_v2 = vadd.f32 %v372_v62, %v366_v60  ;;  %v380_v3 = vadd.f32 %v376_v63, %v367_v61 }
  0x97   : > { %381 = vst [vmem:[%s270_s18] sm:$0xff] %v379_v2  ;;  %382 = vst [vmem:[%s270_s18 + $0x8] sm:$0xff] %v380_v3 }
  0x98   : > { %693 = shalt.err (!%p690_p9)
}
  0x99   : > { %s694_s23 = scalar_lea.hbm %s984_s10, 256  ;;  %s698_s29 = scalar_lea.hbm %s1034_s3, 512 }
  0x9a   : > { %p695_p11 = scmp.ne.s32.totalorder %s984_s10, %s694_s23  ;;  %p699_p13 = scmp.lt.u32.totalorder %s984_s10, %s1034_s3 }
  0x9b   : > { %p700_p8 = scmp.lt.u32.totalorder %s698_s29, %s694_s23  ;;  %p702_p5 = scmp.lt.u32.totalorder %s694_s23, %s984_s10 }
  0x9c   : > { %p696_p3 = pnand %p695_p11, %p1047_p7 }
  0x9d   : > { %p701_p0 = por %p700_p8, %p699_p13 }
  0x9e   : > { %p697_p6 = pneg %p696_p3 }
  0x9f   : > { %p703_p4 = por %p702_p5, %p701_p0 }
  0xa1   : > { %p704_p10 = pnand %p703_p4, %p697_p6 }
  0xa3   : > { %707 = shalt.err (!%p704_p10)
}
  0xa4   : > { %552 = dma.vmem_to_hbm [thread:$0]  (%p1047_p7), %s979_s28, 256, %s984_s10, %s384_s30  }
  0xa5 PF: > { %s412_s5 = sand.u32 1, %s746_s12   ;;  %p1048_p12 = scmp.ne.s32.totalorder %s1040_s27, 0 }
  0xa6   : > { %p1049_p1 = scmp.ge.s32.totalorder %s766_s17, 2  ;;  %s413_s18 = scalar_lea.sflag [#allocation4], %s412_s5 }
  0xa8   : > { %p562_p2 = pnand %p1049_p1, %p1048_p12 }
  0xaa   : > { %741 = dma.done.wait (!%p562_p2), %s413_s18, 256  }
  0xab   : > { %743 = vsyncadd (!%p562_p2), %s413_s18, 4294967040  ;;  %s22_s17 = sadd.s32 1, %s766_s17   ;;  %s1050_s12 = smov %s750_s13 }
  0xac   : > { %p19_p9 = scmp.ge.s32.totalorder %s22_s17, 4   ;;  %s1051_s13 = smov %s754_s14 }
  0xad   : > { %s1052_s14 = smov %s848_s26  ;;  %s1053_s15 = smov %s762_s16 }
  0xae   : > { %s1054_s16 = smov %s1056_s20  ;;  %21 = sbr.rel (!%p19_p9) target bundleno = 8 (0x8), region = 93 }
  0xb5   :  { %418 = vsyncpa [#allocation3], 1 }
  0xb6   :  { %420 = vsyncpa [#allocation3 + $0x1], 1 }
  0xb7   :  { %421 = vsyncpa [#allocation6], 1 }
  0xb8   :  { %423 = vsyncpa [#allocation6 + $0x1], 1 }
  0xb9   :  { %424 = vsyncpa [#allocation4], 1 }
  0xba   :  { %426 = vsyncpa [#allocation4 + $0x1], 1 }

</bundles_post_ra>
